<compile_context>
chip_gen: v7x
topology: tpu7x:2x2x1
jax: 0.10.0
libtpu: 0.0.40
codegen_flags: <defaults>
</compile_context>

<pallas_src>
import functools

import jax
import jax.numpy as jnp
from jax.experimental import pallas as pl
from jax.experimental.pallas import tpu as pltpu

# SELU constants (match torch.nn.SELU)
_SELU_ALPHA = 1.6732632423543772
_SELU_SCALE = 1.0507009873554805

# Per-step VMEM budget for the streamed tiles + intermediates.  Chosen to fit
# comfortably inside the 32 MiB scoped-VMEM default on all generations (v7x
# physical VMEM is only 64 MiB per TensorCore), leaving headroom for the
# (tiny) resident weights and compiler temporaries.
_VMEM_BUDGET_BYTES = 20 * 1024 * 1024
_DEFAULT_TARGET_PAIRS = 2048   # pair-rows per grid step (= 4096 batch rows)


def _selu(x):
    # exp only feeds the x<=0 branch; the clamp keeps the dead branch finite.
    # (Also keeps SELU finite on the garbage rows of a partial last block.)
    return _SELU_SCALE * jnp.where(
        x > 0, x, _SELU_ALPHA * (jnp.exp(jnp.minimum(x, 0.0)) - 1.0))


def _mm(a, w_ref):
    # Cast the activation to the (possibly bf16) weight dtype for the MXU,
    # always accumulate in f32.
    return jnp.dot(a.astype(w_ref.dtype), w_ref[...],
                   preferred_element_type=jnp.float32)


def _mlp_kernel(obs_ref, act_ref, w1o_ref, w1a_ref, b1_ref,
                w2_ref, b2_ref, w3_ref, b3_ref, o_ref):
    # Fused 3-layer MLP on one (block_pairs, ...) tile of paired batch rows.
    h1 = _selu(_mm(obs_ref[...], w1o_ref) + _mm(act_ref[...], w1a_ref)
               + b1_ref[...])
    h2 = _selu(_mm(h1, w2_ref) + b2_ref[...])
    y = _mm(h2, w3_ref) + b3_ref[...]
    o_ref[...] = y.astype(o_ref.dtype)


def _round_up(x, m):
    return ((x + m - 1) // m) * m


def _blockdiag2(w):
    """[[w, 0], [0, w]] — applies w independently to each half of a row-pair."""
    k, n = w.shape
    z = jnp.zeros((k, n), w.dtype)
    return jnp.concatenate(
        [jnp.concatenate([w, z], axis=1),
         jnp.concatenate([z, w], axis=1)], axis=0)


def _pick_block_pairs(n_pairs, target_pairs, bytes_per_pair):
    """Pair-rows per grid step.

    Rules: multiple of 8 sublanes; bounded by the VMEM budget and the batch;
    and (when the batch is big enough) an EVEN number of >=2 grid steps so the
    'parallel' batch axis splits evenly across both v7x TensorCores.
    """
    if n_pairs <= 8:
        return max(n_pairs, 1)                       # single full block
    vmem_cap = max(8, _VMEM_BUDGET_BYTES // max(bytes_per_pair, 1))
    cap = max(8, (min(target_pairs, vmem_cap, n_pairs) // 8) * 8)
    steps = max(2, pl.cdiv(n_pairs, cap))
    if steps % 2:
        steps += 1                                   # even step count (2 TCs)
    return min(cap, max(8, _round_up(pl.cdiv(n_pairs, steps), 8)))


@functools.partial(
    jax.jit,
    static_argnames=("n_heads", "feature_dim", "block_pairs", "use_bf16",
                     "out_dtype"))
def multihead_sf_forward(observations, actions, params, *, n_heads, feature_dim,
                         block_pairs=None, use_bf16=True, out_dtype=None):
    """Pallas implementation of MultiheadSFNetwork.forward (batched inputs).

    out_dtype defaults to observations.dtype (note: bf16 observations imply a
    bf16 output store even though compute is f32).  Pass jnp.bfloat16 to halve
    the dominant output HBM stream if downstream tolerates it.
    """
    B, obs_dim = observations.shape
    _, act_dim = actions.shape
    w1, b1, w2, b2, w3, b3 = params
    h1_dim = w1.shape[1]
    h2_dim = w2.shape[1]
    d_out = w3.shape[1]
    assert d_out == n_heads * feature_dim
    out_dtype = observations.dtype if out_dtype is None else jnp.dtype(out_dtype)

    # --- parameter plumbing (tiny tensors, done once per call) -------------
    wdt = jnp.bfloat16 if use_bf16 else w1.dtype
    w1o2 = _blockdiag2(w1[:obs_dim]).astype(wdt)    # (2*obs_dim, 2*h1)
    w1a2 = _blockdiag2(w1[obs_dim:]).astype(wdt)    # (2*act_dim, 2*h1)
    w22 = _blockdiag2(w2).astype(wdt)               # (2*h1,      2*h2)
    w32 = _blockdiag2(w3).astype(wdt)               # (2*h2,      2*d_out)
    b12 = jnp.concatenate([b1, b1], axis=1).astype(jnp.float32)
    b22 = jnp.concatenate([b2, b2], axis=1).astype(jnp.float32)
    b32 = jnp.concatenate([b3, b3], axis=1).astype(jnp.float32)

    # --- fold pairs of batch rows; pad ONLY to even B (pairing needs it) ----
    B_even = _round_up(B, 2)
    if B_even != B:
        observations = jnp.pad(observations, ((0, B_even - B), (0, 0)))
        actions = jnp.pad(actions, ((0, B_even - B), (0, 0)))
    n_pairs = B_even // 2
    obs2 = observations.reshape(n_pairs, 2 * obs_dim)  # row p = [x[2p], x[2p+1]]
    act2 = actions.reshape(n_pairs, 2 * act_dim)

    # --- tile size: VMEM-budgeted, amortizes per-step pipeline overhead -----
    in_isz = jnp.dtype(obs2.dtype).itemsize
    out_isz = jnp.dtype(out_dtype).itemsize
    bytes_per_pair = (
        2 * (2 * (obs_dim + act_dim) * in_isz + 2 * d_out * out_isz)  # 2x-buffered I/O
        + 2 * (h1_dim + h2_dim) * 4)                                  # f32 h1/h2
    target = _DEFAULT_TARGET_PAIRS if block_pairs is None else block_pairs
    bp = _pick_block_pairs(n_pairs, target, bytes_per_pair)

    grid = (pl.cdiv(n_pairs, bp),)   # ragged tail handled by Pallas masking
    const2d = lambda a: pl.BlockSpec(a.shape, lambda i: (0, 0))

    y2 = pl.pallas_call(
        _mlp_kernel,
        out_shape=jax.ShapeDtypeStruct((n_pairs, 2 * d_out), out_dtype),
        grid=grid,
        in_specs=[
            pl.BlockSpec((bp, 2 * obs_dim), lambda i: (i, 0)),  # streamed
            pl.BlockSpec((bp, 2 * act_dim), lambda i: (i, 0)),  # streamed
            const2d(w1o2), const2d(w1a2), const2d(b12),         # VMEM-resident
            const2d(w22), const2d(b22),
            const2d(w32), const2d(b32),
        ],
        out_specs=pl.BlockSpec((bp, 2 * d_out), lambda i: (i, 0)),
        compiler_params=pltpu.CompilerParams(
            dimension_semantics=("parallel",)),
    )(obs2, act2, w1o2, w1a2, b12, w22, b22, w32, b32)

    # Un-pair: row p of y2 is [y[2p], y[2p+1]] contiguously (metadata-only
    # reshapes; the [:B] slice only exists when B was odd).
    y = y2.reshape(B_even, d_out)
    if B_even != B:
        y = y[:B]
    return y.reshape(B, n_heads, feature_dim)


def _xavier_uniform(key, shape, dtype=jnp.float32):
    fan_in, fan_out = shape
    limit = jnp.sqrt(6.0 / (fan_in + fan_out))
    return jax.random.uniform(key, shape, dtype, minval=-limit, maxval=limit)


def init_params(key, observation_dim, action_dim, feature_dim, n_heads,
                sizes=(64, 64), dtype=jnp.float32):
    d_in = observation_dim + action_dim
    d_out = feature_dim * n_heads
    dims = [d_in, *sizes, d_out]
    params = []
    for i in range(len(dims) - 1):
        key, wk = jax.random.split(key)
        w = _xavier_uniform(wk, (dims[i], dims[i + 1]), dtype)
        b = jnp.zeros((1, dims[i + 1]), dtype)  # biases kept 2-D for TPU layout
        params.extend([w, b])
    return tuple(params)


def _reference_forward(observations, actions, params, n_heads, feature_dim):
    x = jnp.concatenate([observations, actions], axis=1)
    w1, b1, w2, b2, w3, b3 = params
    h = _selu(x @ w1 + b1)
    h = _selu(h @ w2 + b2)
    y = h @ w3 + b3
    return y.reshape(-1, n_heads, feature_dim)


if __name__ == "__main__":
    observation_dim = 24
    action_dim = 8
    feature_dim = 16
    n_heads = 4

    key = jax.random.PRNGKey(0)
    params = init_params(jax.random.fold_in(key, 123),
                         observation_dim, action_dim, feature_dim, n_heads)

    # (batch, kwargs, tolerance):
    #  - batch=8  f32: exact semantics, single-block path, tight tolerance
    #  - batch=7  f32: odd batch -> even-padding path
    #  - batch=1000 bf16 compute + bf16 output: perf path, multi-step ragged
    #    grid (2 steps of 256/244 pair-rows), looser tolerance.
    cases = [
        (8, dict(use_bf16=False), 1e-5),
        (7, dict(use_bf16=False), 1e-5),
        (1000, dict(use_bf16=True, out_dtype=jnp.bfloat16), 5e-2),
    ]
    for batch, kwargs, tol in cases:
        ko, ka = jax.random.split(jax.random.fold_in(key, batch))
        obs = jax.random.normal(ko, (batch, observation_dim), jnp.float32)
        act = jax.random.normal(ka, (batch, action_dim), jnp.float32)

        out = multihead_sf_forward(obs, act, params,
                                   n_heads=n_heads, feature_dim=feature_dim,
                                   **kwargs)
        out = jax.block_until_ready(out)
        assert out.shape == (batch, n_heads, feature_dim), out.shape

        ref = _reference_forward(obs, act, params, n_heads, feature_dim)
        assert jnp.allclose(out.astype(jnp.float32), ref, atol=tol, rtol=tol), \
            f"mismatch vs reference at batch={batch}"

    print("KERNEL_OK")
</pallas_src>

<mosaic_0001>
module attributes {stable_mosaic.version = 11 : i64} {
  func.func @_mlp_kernel(%arg0: i32, %arg1: memref<4x48xf32, #tpu.memory_space<vmem>>, %arg2: memref<4x16xf32, #tpu.memory_space<vmem>>, %arg3: memref<48x128xf32, #tpu.memory_space<vmem>>, %arg4: memref<16x128xf32, #tpu.memory_space<vmem>>, %arg5: memref<1x128xf32, #tpu.memory_space<vmem>>, %arg6: memref<128x128xf32, #tpu.memory_space<vmem>>, %arg7: memref<1x128xf32, #tpu.memory_space<vmem>>, %arg8: memref<128x128xf32, #tpu.memory_space<vmem>>, %arg9: memref<1x128xf32, #tpu.memory_space<vmem>>, %arg10: memref<4x128xf32, #tpu.memory_space<vmem>>) attributes {dimension_semantics = [#tpu.dimension_semantics<parallel>], iteration_bounds = array<i64: 1>, scalar_prefetch = 0 : i64, scratch_operands = 0 : i64, tpu.core_type = #tpu.core_type<tc>, window_params = [{transform_indices = @transform_0, window_bounds = array<i64: 4, 48>}, {transform_indices = @transform_1, window_bounds = array<i64: 4, 16>}, {pipeline_mode = #tpu.pipeline_mode<synchronous>, transform_indices = @transform_2, window_bounds = array<i64: 48, 128>}, {pipeline_mode = #tpu.pipeline_mode<synchronous>, transform_indices = @transform_3, window_bounds = array<i64: 16, 128>}, {pipeline_mode = #tpu.pipeline_mode<synchronous>, transform_indices = @transform_4, window_bounds = array<i64: 1, 128>}, {pipeline_mode = #tpu.pipeline_mode<synchronous>, transform_indices = @transform_5, window_bounds = array<i64: 128, 128>}, {pipeline_mode = #tpu.pipeline_mode<synchronous>, transform_indices = @transform_6, window_bounds = array<i64: 1, 128>}, {pipeline_mode = #tpu.pipeline_mode<synchronous>, transform_indices = @transform_7, window_bounds = array<i64: 128, 128>}, {pipeline_mode = #tpu.pipeline_mode<synchronous>, transform_indices = @transform_8, window_bounds = array<i64: 1, 128>}, {transform_indices = @transform_9, window_bounds = array<i64: 4, 128>}]} {
    %c0 = arith.constant 0 : index
    %c0_0 = arith.constant 0 : index
    %0 = vector.load %arg1[%c0, %c0_0] : memref<4x48xf32, #tpu.memory_space<vmem>>, vector<4x48xf32>
    %c0_1 = arith.constant 0 : index
    %c0_2 = arith.constant 0 : index
    %1 = vector.load %arg3[%c0_1, %c0_2] : memref<48x128xf32, #tpu.memory_space<vmem>>, vector<48x128xf32>
    %cst = arith.constant dense<0.000000e+00> : vector<4x128xf32>
    %2 = tpu.matmul %0, %1, %cst {dimension_numbers = #tpu.dot_dimension_numbers<[1], [0], [0], [1], [0, 0, 1, 1], [], []>} : vector<4x48xf32>, vector<48x128xf32>, vector<4x128xf32> -> vector<4x128xf32>
    %c0_3 = arith.constant 0 : index
    %c0_4 = arith.constant 0 : index
    %3 = vector.load %arg2[%c0_3, %c0_4] : memref<4x16xf32, #tpu.memory_space<vmem>>, vector<4x16xf32>
    %c0_5 = arith.constant 0 : index
    %c0_6 = arith.constant 0 : index
    %4 = vector.load %arg4[%c0_5, %c0_6] : memref<16x128xf32, #tpu.memory_space<vmem>>, vector<16x128xf32>
    %cst_7 = arith.constant dense<0.000000e+00> : vector<4x128xf32>
    %5 = tpu.matmul %3, %4, %cst_7 {dimension_numbers = #tpu.dot_dimension_numbers<[1], [0], [0], [1], [0, 0, 1, 1], [], []>} : vector<4x16xf32>, vector<16x128xf32>, vector<4x128xf32> -> vector<4x128xf32>
    %6 = arith.addf %2, %5 : vector<4x128xf32>
    %c0_8 = arith.constant 0 : index
    %c0_9 = arith.constant 0 : index
    %7 = vector.load %arg5[%c0_8, %c0_9] : memref<1x128xf32, #tpu.memory_space<vmem>>, vector<1x128xf32>
    %8 = vector.broadcast %7 : vector<1x128xf32> to vector<4x128xf32>
    %9 = arith.addf %6, %8 : vector<4x128xf32>
    %cst_10 = arith.constant 0.000000e+00 : f32
    %10 = vector.broadcast %cst_10 : f32 to vector<4x128xf32>
    %11 = arith.cmpf ogt, %9, %10 : vector<4x128xf32>
    %cst_11 = arith.constant 0.000000e+00 : f32
    %12 = vector.broadcast %cst_11 : f32 to vector<4x128xf32>
    %13 = arith.minimumf %9, %12 : vector<4x128xf32>
    %14 = math.exp %13 : vector<4x128xf32>
    %cst_12 = arith.constant 1.000000e+00 : f32
    %15 = vector.broadcast %cst_12 : f32 to vector<4x128xf32>
    %16 = arith.subf %14, %15 : vector<4x128xf32>
    %cst_13 = arith.constant 1.67326319 : f32
    %17 = vector.broadcast %cst_13 : f32 to vector<4x128xf32>
    %18 = arith.mulf %17, %16 : vector<4x128xf32>
    %19 = arith.select %11, %9, %18 : vector<4x128xi1>, vector<4x128xf32>
    %cst_14 = arith.constant 1.05070102 : f32
    %20 = vector.broadcast %cst_14 : f32 to vector<4x128xf32>
    %21 = arith.mulf %20, %19 : vector<4x128xf32>
    %c0_15 = arith.constant 0 : index
    %c0_16 = arith.constant 0 : index
    %22 = vector.load %arg6[%c0_15, %c0_16] : memref<128x128xf32, #tpu.memory_space<vmem>>, vector<128x128xf32>
    %cst_17 = arith.constant dense<0.000000e+00> : vector<4x128xf32>
    %23 = tpu.matmul %21, %22, %cst_17 {dimension_numbers = #tpu.dot_dimension_numbers<[1], [0], [0], [1], [0, 0, 1, 1], [], []>} : vector<4x128xf32>, vector<128x128xf32>, vector<4x128xf32> -> vector<4x128xf32>
    %c0_18 = arith.constant 0 : index
    %c0_19 = arith.constant 0 : index
    %24 = vector.load %arg7[%c0_18, %c0_19] : memref<1x128xf32, #tpu.memory_space<vmem>>, vector<1x128xf32>
    %25 = vector.broadcast %24 : vector<1x128xf32> to vector<4x128xf32>
    %26 = arith.addf %23, %25 : vector<4x128xf32>
    %cst_20 = arith.constant 0.000000e+00 : f32
    %27 = vector.broadcast %cst_20 : f32 to vector<4x128xf32>
    %28 = arith.cmpf ogt, %26, %27 : vector<4x128xf32>
    %cst_21 = arith.constant 0.000000e+00 : f32
    %29 = vector.broadcast %cst_21 : f32 to vector<4x128xf32>
    %30 = arith.minimumf %26, %29 : vector<4x128xf32>
    %31 = math.exp %30 : vector<4x128xf32>
    %cst_22 = arith.constant 1.000000e+00 : f32
    %32 = vector.broadcast %cst_22 : f32 to vector<4x128xf32>
    %33 = arith.subf %31, %32 : vector<4x128xf32>
    %cst_23 = arith.constant 1.67326319 : f32
    %34 = vector.broadcast %cst_23 : f32 to vector<4x128xf32>
    %35 = arith.mulf %34, %33 : vector<4x128xf32>
    %36 = arith.select %28, %26, %35 : vector<4x128xi1>, vector<4x128xf32>
    %cst_24 = arith.constant 1.05070102 : f32
    %37 = vector.broadcast %cst_24 : f32 to vector<4x128xf32>
    %38 = arith.mulf %37, %36 : vector<4x128xf32>
    %c0_25 = arith.constant 0 : index
    %c0_26 = arith.constant 0 : index
    %39 = vector.load %arg8[%c0_25, %c0_26] : memref<128x128xf32, #tpu.memory_space<vmem>>, vector<128x128xf32>
    %cst_27 = arith.constant dense<0.000000e+00> : vector<4x128xf32>
    %40 = tpu.matmul %38, %39, %cst_27 {dimension_numbers = #tpu.dot_dimension_numbers<[1], [0], [0], [1], [0, 0, 1, 1], [], []>} : vector<4x128xf32>, vector<128x128xf32>, vector<4x128xf32> -> vector<4x128xf32>
    %c0_28 = arith.constant 0 : index
    %c0_29 = arith.constant 0 : index
    %41 = vector.load %arg9[%c0_28, %c0_29] : memref<1x128xf32, #tpu.memory_space<vmem>>, vector<1x128xf32>
    %42 = vector.broadcast %41 : vector<1x128xf32> to vector<4x128xf32>
    %43 = arith.addf %40, %42 : vector<4x128xf32>
    %c0_30 = arith.constant 0 : index
    %c0_31 = arith.constant 0 : index
    %44 = vector.load %arg10[%c0_30, %c0_31] : memref<4x128xf32, #tpu.memory_space<vmem>>, vector<4x128xf32>
    tpu.vector_store %arg10[%c0_30, %c0_31], %43 {strides = array<i32>} : memref<4x128xf32, #tpu.memory_space<vmem>>, vector<4x128xf32>,
    return
  }
  func.func @transform_0(%arg0: i32) -> (i32, i32) {
    %c0_i32 = arith.constant 0 : i32
    %c0_i32_0 = arith.constant 0 : i32
    return %arg0, %c0_i32 : i32, i32
  }
  func.func @transform_1(%arg0: i32) -> (i32, i32) {
    %c0_i32 = arith.constant 0 : i32
    %c0_i32_0 = arith.constant 0 : i32
    return %arg0, %c0_i32 : i32, i32
  }
  func.func @transform_2(%arg0: i32) -> (i32, i32) {
    %c0_i32 = arith.constant 0 : i32
    %c0_i32_0 = arith.constant 0 : i32
    %c0_i32_1 = arith.constant 0 : i32
    return %c0_i32, %c0_i32_0 : i32, i32
  }
  func.func @transform_3(%arg0: i32) -> (i32, i32) {
    %c0_i32 = arith.constant 0 : i32
    %c0_i32_0 = arith.constant 0 : i32
    %c0_i32_1 = arith.constant 0 : i32
    return %c0_i32, %c0_i32_0 : i32, i32
  }
  func.func @transform_4(%arg0: i32) -> (i32, i32) {
    %c0_i32 = arith.constant 0 : i32
    %c0_i32_0 = arith.constant 0 : i32
    %c0_i32_1 = arith.constant 0 : i32
    return %c0_i32, %c0_i32_0 : i32, i32
  }
  func.func @transform_5(%arg0: i32) -> (i32, i32) {
    %c0_i32 = arith.constant 0 : i32
    %c0_i32_0 = arith.constant 0 : i32
    %c0_i32_1 = arith.constant 0 : i32
    return %c0_i32, %c0_i32_0 : i32, i32
  }
  func.func @transform_6(%arg0: i32) -> (i32, i32) {
    %c0_i32 = arith.constant 0 : i32
    %c0_i32_0 = arith.constant 0 : i32
    %c0_i32_1 = arith.constant 0 : i32
    return %c0_i32, %c0_i32_0 : i32, i32
  }
  func.func @transform_7(%arg0: i32) -> (i32, i32) {
    %c0_i32 = arith.constant 0 : i32
    %c0_i32_0 = arith.constant 0 : i32
    %c0_i32_1 = arith.constant 0 : i32
    return %c0_i32, %c0_i32_0 : i32, i32
  }
  func.func @transform_8(%arg0: i32) -> (i32, i32) {
    %c0_i32 = arith.constant 0 : i32
    %c0_i32_0 = arith.constant 0 : i32
    %c0_i32_1 = arith.constant 0 : i32
    return %c0_i32, %c0_i32_0 : i32, i32
  }
  func.func @transform_9(%arg0: i32) -> (i32, i32) {
    %c0_i32 = arith.constant 0 : i32
    %c0_i32_0 = arith.constant 0 : i32
    return %arg0, %c0_i32 : i32, i32
  }
}

</mosaic_0001>

<bundles_post_ra>
// kernel: multihead_sf_forward.1
= control target key start
LH: loop header
LB: loop body
LE: loop exit
PB: predicated region body
PF: predicated region fallthrough
CT: control target
= control target key end

     0   :  { %v615_v0 = vmov 0.0|0.0   ;;  %vm616_vm0 = vmmov 0   ;;  %v617_v8 = vmov 0.0   ;;  %vm42_vm1 = vcmask 130048   ;;  %s830_s2 = inlined_call_operand.vmem [shape: f32[48,128], index: 2, kind: input, shape index: {}]   ;;  %s831_s3 = inlined_call_operand.vmem [shape: f32[16,128], index: 3, kind: input, shape index: {}]   ;;  %s832_s5 = inlined_call_operand.vmem [shape: f32[128,128], index: 5, kind: input, shape index: {}]   ;;  %s833_s1 = inlined_call_operand.vmem [shape: f32[4,16], index: 1, kind: input, shape index: {}]   ;;  %s834_s0 = inlined_call_operand.vmem [shape: f32[4,48], index: 0, kind: input, shape index: {}]   ;;  %s835_s7 = inlined_call_operand.vmem [shape: f32[128,128], index: 7, kind: input, shape index: {}]   ;;  %s836_s4 = inlined_call_operand.vmem [shape: f32[1,128], index: 4, kind: input, shape index: {}]   ;;  %s837_s6 = inlined_call_operand.vmem [shape: f32[1,128], index: 6, kind: input, shape index: {}]   ;;  %s838_s8 = inlined_call_operand.vmem [shape: f32[1,128], index: 8, kind: input, shape index: {}]   ;;  %s839_s9 = inlined_call_operand.vmem [shape: f32[4,128], index: 9, kind: output, shape index: {}]  }
   0x1   :  { %551 = vmatprep.subr.bf16.mxu1 %v615_v0  ;;  %v33_v1 = vld [vmem:[%s830_s2] sm:$0xff]  ;;  %v34_v2 = vld [vmem:[%s830_s2 + $0x8] sm:$0xff]  ;;  %v35_v3 = vld [vmem:[%s830_s2 + $0x10] sm:$0xff]  ;;  %548 = vmatprep.subr.bf16.mxu0 %v615_v0  ;;  %vm116_vm2 = vcmask 392192  }
   0x2   :  { %v552_v4 = vpack.c.bf16 %v34_v2, %v33_v1  ;;  %v36_v5 = vld [vmem:[%s830_s2 + $0x18] sm:$0xff]  ;;  %v40_v6 = vld [vmem:[%s831_s3] sm:$0xff]  ;;  %v41_v7 = vld [vmem:[%s831_s3 + $0x8] sm:$0xff]  ;;  %460 = vmatprep.mubr.msk.f32.mxu0 %vm616_vm0, %v617_v8  ;;  %475 = vmatprep.mubr.msk.f32.mxu1 %vm616_vm0, %v617_v8 }
   0x3   :  { %v549_v9 = vpack.c.bf16 %v41_v7, %v40_v6  ;;  %v555_v10 = vpack.c.bf16 %v36_v5, %v35_v3  ;;  %v206_v11 = vld [vmem:[%s832_s5] sm:$0xff]  ;;  %v207_v12 = vld [vmem:[%s832_s5 + $0x8] sm:$0xff]  ;;  %v208_v19 = vld [vmem:[%s832_s5 + $0x10] sm:$0xff] }
   0x4   :  { %553 = vmatpush3.bf16.msra.mxu1 %v552_v4  ;;  %v37_v13 = vld [vmem:[%s830_s2 + $0x20] sm:$0xff]  ;;  %v38_v14 = vld [vmem:[%s830_s2 + $0x28] sm:$0xff]  ;;  %v561_v16 = vpack.c.bf16 %v207_v12, %v206_v11  ;;  %v209_v20 = vld [vmem:[%s832_s5 + $0x18] sm:$0xff] }
   0x5   :  { %554 = vmatprep.subr.bf16.mxu1 %v615_v0  ;;  %550 = vmatpush3.bf16.msra.mxu0 %v549_v9  ;;  %v39_v15 = vld [vmem:[%s833_s1] sm:$0xf]  ;;  %v558_v17 = vpack.c.bf16 %v38_v14, %v37_v13  ;;  %v564_v21 = vpack.c.bf16 %v209_v20, %v208_v19  ;;  %v211_v23 = vld [vmem:[%s832_s5 + $0x28] sm:$0xff]  ;;  %v212_v25 = vld [vmem:[%s832_s5 + $0x30] sm:$0xff] }
   0x6   :  { %560 = vmatprep.subr.bf16.mxu0 %v615_v0  ;;  %v32_v18 = vld [vmem:[%s834_s0] sm:$0xf]  ;;  %v213_v26 = vld [vmem:[%s832_s5 + $0x38] sm:$0xff]  ;;  %v215_v29 = vld [vmem:[%s832_s5 + $0x48] sm:$0xff] }
   0x7   :  { %v210_v22 = vld [vmem:[%s832_s5 + $0x20] sm:$0xff]  ;;  %v570_v27 = vpack.c.bf16 %v213_v26, %v212_v25  ;;  %v216_v31 = vld [vmem:[%s832_s5 + $0x50] sm:$0xff]  ;;  %v217_v32 = vld [vmem:[%s832_s5 + $0x58] sm:$0xff] }
   0x8   :  { %556 = vmatpush3.bf16.msra.mxu1 %v555_v10  ;;  %461 = vmatmul.mubr.msk.f32.vlgmr.msra.gmra.mrb[0].mxu0 %vm42_vm1, %v39_v15  ;;  %v567_v24 = vpack.c.bf16 %v211_v23, %v210_v22  ;;  %v214_v28 = vld [vmem:[%s832_s5 + $0x40] sm:$0xff]  ;;  %v576_v33 = vpack.c.bf16 %v217_v32, %v216_v31  ;;  %v219_v35 = vld [vmem:[%s832_s5 + $0x68] sm:$0xff]  ;;  %v220_v37 = vld [vmem:[%s832_s5 + $0x70] sm:$0xff] }
   0x9   :  { %557 = vmatprep.subr.bf16.mxu1 %v615_v0  ;;  %562 = vmatpush3.bf16.msra.mxu0 %v561_v16  ;;  %v573_v30 = vpack.c.bf16 %v215_v29, %v214_v28  ;;  %v218_v34 = vld [vmem:[%s832_s5 + $0x60] sm:$0xff]  ;;  %v221_v38 = vld [vmem:[%s832_s5 + $0x78] sm:$0xff]  ;;  %v308_v41 = vld [vmem:[%s835_s7 + $0x8] sm:$0xff] }
   0xa   :  { %563 = vmatprep.subr.bf16.mxu0 %v615_v0  ;;  %510 = vmatprep.mubr.msk.f32.mxu0 %vm616_vm0, %v617_v8  ;;  %v579_v36 = vpack.c.bf16 %v219_v35, %v218_v34  ;;  %v582_v39 = vpack.c.bf16 %v221_v38, %v220_v37  ;;  %v307_v40 = vld [vmem:[%s835_s7] sm:$0xff]  ;;  %v309_v42 = vld [vmem:[%s835_s7 + $0x10] sm:$0xff]  ;;  %v310_v44 = vld [vmem:[%s835_s7 + $0x18] sm:$0xff] }
   0xb   :  { %v585_v43 = vpack.c.bf16 %v308_v41, %v307_v40  ;;  %v588_v45 = vpack.c.bf16 %v310_v44, %v309_v42  ;;  %v407_v49 = vld [vmem:[%s836_s4] ss:$0 sm:$0xff]  ;;  %v312_v61 = vld [vmem:[%s835_s7 + $0x28] sm:$0xff]  ;;  %v313_v63 = vld [vmem:[%s835_s7 + $0x30] sm:$0xff] }
   0xc   :  { %559 = vmatpush3.bf16.msra.mxu1 %v558_v17  ;;  %v311_v60 = vld [vmem:[%s835_s7 + $0x20] sm:$0xff]  ;;  %v314_v1 = vld [vmem:[%s835_s7 + $0x38] sm:$0xff]  ;;  %v316_v4 = vld [vmem:[%s835_s7 + $0x48] sm:$0xff] }
   0xd   :  { %584 = vmatprep.subr.bf16.mxu1 %v615_v0  ;;  %565 = vmatpush3.bf16.msra.mxu0 %v564_v21  ;;  %v591_v62 = vpack.c.bf16 %v312_v61, %v311_v60  ;;  %v594_v2 = vpack.c.bf16 %v314_v1, %v313_v63  ;;  %v315_v3 = vld [vmem:[%s835_s7 + $0x40] sm:$0xff]  ;;  %v317_v6 = vld [vmem:[%s835_s7 + $0x50] sm:$0xff]  ;;  %v318_v7 = vld [vmem:[%s835_s7 + $0x58] sm:$0xff] }
   0xe   :  { %566 = vmatprep.subr.bf16.mxu0 %v615_v0  ;;  %v597_v5 = vpack.c.bf16 %v316_v4, %v315_v3  ;;  %v319_v9 = vld [vmem:[%s835_s7 + $0x60] sm:$0xff]  ;;  %v320_v10 = vld [vmem:[%s835_s7 + $0x68] sm:$0xff]  ;;  %v321_v12 = vld [vmem:[%s835_s7 + $0x70] sm:$0xff] }
   0xf   :  { %476 = vmatmul.mubr.msk.f32.vlgmr.msra.gmra.mrb[0].mxu1 %vm116_vm2, %v32_v18  ;;  %v603_v11 = vpack.c.bf16 %v320_v10, %v319_v9  ;;  %v322_v13 = vld [vmem:[%s835_s7 + $0x78] sm:$0xff]  ;;  %v409_v15 = vld [vmem:[%s837_s6] ss:$0 sm:$0xff] }
  0x10   :  { %545 = vmatprep.mubr.msk.f32.mxu1 %vm616_vm0, %v617_v8  ;;  %586 = vmatpush3.bf16.msra.mxu1 %v585_v43  ;;  %v600_v8 = vpack.c.bf16 %v318_v7, %v317_v6  ;;  %v606_v14 = vpack.c.bf16 %v322_v13, %v321_v12  ;;  %v411_v25 = vld [vmem:[%s838_s8] ss:$0 sm:$0xff] }
  0x11   :  { %568 = vmatpush3.bf16.msra.mxu0 %v567_v24  ;;  %587 = vmatprep.subr.bf16.mxu1 %v615_v0 }
  0x12   :  { %569 = vmatprep.subr.bf16.mxu0 %v615_v0 }
  0x14   :  { %589 = vmatpush3.bf16.msra.mxu1 %v588_v45 }
  0x15   :  { %571 = vmatpush3.bf16.msra.mxu0 %v570_v27  ;;  %590 = vmatprep.subr.bf16.mxu1 %v615_v0 }
  0x16   :  { %572 = vmatprep.subr.bf16.mxu0 %v615_v0 }
  0x18   :  { %592 = vmatpush3.bf16.msra.mxu1 %v591_v62 }
  0x19   :  { %574 = vmatpush3.bf16.msra.mxu0 %v573_v30  ;;  %593 = vmatprep.subr.bf16.mxu1 %v615_v0 }
  0x1a   :  { %575 = vmatprep.subr.bf16.mxu0 %v615_v0 }
  0x1c   :  { %595 = vmatpush3.bf16.msra.mxu1 %v594_v2 }
  0x1d   :  { %577 = vmatpush3.bf16.msra.mxu0 %v576_v33  ;;  %596 = vmatprep.subr.bf16.mxu1 %v615_v0 }
  0x1e   :  { %578 = vmatprep.subr.bf16.mxu0 %v615_v0 }
  0x20   :  { %598 = vmatpush3.bf16.msra.mxu1 %v597_v5 }
  0x21   :  { %580 = vmatpush3.bf16.msra.mxu0 %v579_v36  ;;  %599 = vmatprep.subr.bf16.mxu1 %v615_v0 }
  0x22   :  { %581 = vmatprep.subr.bf16.mxu0 %v615_v0 }
  0x24   :  { %601 = vmatpush3.bf16.msra.mxu1 %v600_v8 }
  0x25   :  { %583 = vmatpush3.bf16.msra.mxu0 %v582_v39  ;;  %602 = vmatprep.subr.bf16.mxu1 %v615_v0 }
  0x28   :  { %604 = vmatpush3.bf16.msra.mxu1 %v603_v11 }
  0x29   :  { %605 = vmatprep.subr.bf16.mxu1 %v615_v0 }
  0x2c   :  { %607 = vmatpush3.bf16.msra.mxu1 %v606_v14 }
  0xdb   :  { %v112_v46 = vpop.f32.mrb[0].mxu0 }
  0xdc   :  { %v462_v47 = vpop.f32.mrb[1].mxu0 }
  0xe2   :  { %v186_v48 = vpop.f32.mrb[0].mxu1 }
  0xe3   :  { %v187_v50 = vadd.f32 %v186_v48, %v112_v46  ;;  %v477_v51 = vpop.f32.mrb[1].mxu1 }
  0xe5   :  { %v197_v52 = vadd.f32 %v407_v49, %v187_v50 }
  0xe7   :  { %v199_v53 = vmin.f32 %v197_v52, 0.0  ;;  %vm198_vm3 = vcmp.gt.f32.partialorder %v197_v52, 0.0 }
  0xe9   :  { %v200_v54 = vmul.f32 1.442695, %v199_v53 }
  0xeb   :  { %611 = vpow2.f32 %v200_v54 }
  0xf5   :  { %v612_v55 = vpop.eup %611 }
  0xf6   :  { %v408_v56 = vadd.f32 -1.0, %v612_v55 }
  0xf8   :  { %v203_v57 = vmul.f32 1.6732632, %v408_v56 }
  0xfa   :  { %v204_v58 = vsel %vm198_vm3, %v197_v52, %v203_v57 }
  0xfb   :  { %v205_v59 = vmul.f32 1.050701, %v204_v58 }
  0xfd   :  { %511 = vmatmul.mubr.f32.vlgmr.msra.gmra.mrb[2].mxu0 %v205_v59 }
 0x1d0   :  { %v295_v16 = vpop.f32.mrb[2].mxu0 }
 0x1d1   :  { %v296_v17 = vadd.f32 %v409_v15, %v295_v16  ;;  %v512_v18 = vpop.f32.mrb[3].mxu0 }
 0x1d3   :  { %v300_v19 = vmin.f32 %v296_v17, 0.0  ;;  %vm299_vm4 = vcmp.gt.f32.partialorder %v296_v17, 0.0 }
 0x1d5   :  { %v301_v20 = vmul.f32 1.442695, %v300_v19 }
 0x1d7   :  { %613 = vpow2.f32 %v301_v20 }
 0x1e1   :  { %v614_v0 = vpop.eup %613 }
 0x1e2   :  { %v410_v21 = vadd.f32 -1.0, %v614_v0 }
 0x1e4   :  { %v304_v22 = vmul.f32 1.6732632, %v410_v21 }
 0x1e6   :  { %v305_v23 = vsel %vm299_vm4, %v296_v17, %v304_v22 }
 0x1e7   :  { %v306_v24 = vmul.f32 1.050701, %v305_v23 }
 0x1e9   :  { %546 = vmatmul.mubr.f32.vlgmr.msra.gmra.mrb[2].mxu1 %v306_v24 }
 0x2bc   :  { %v396_v26 = vpop.f32.mrb[2].mxu1 }
 0x2bd   :  { %v397_v27 = vadd.f32 %v411_v25, %v396_v26  ;;  %v547_v28 = vpop.f32.mrb[3].mxu1 }
 0x2bf   :  { %400 = vst [vmem:[%s839_s9] sm:$0xf] %v397_v27 }

</bundles_post_ra>
